<compile_context>
chip_gen: v6e
topology: v6e:2x2x1
jax: 0.10.0
libtpu: 0.0.40
codegen_flags: <defaults>
</compile_context>

<pallas_src>
import functools

import jax
import jax.numpy as jnp
from jax.experimental import pallas as pl
from jax.experimental.pallas import tpu as pltpu


def _round_up(x, m):
    return ((x + m - 1) // m) * m


def _sublane(dtype):
    # packed-sublane multiple: 8 for 4-byte, 16 for 2-byte, 32 for 1-byte
    return 32 // jnp.dtype(dtype).itemsize


def zencoder_kernel(r_ref, w1_ref, w_ref, wout_ref, b_ref, out_ref, *, nout):
    """One batch tile of the full ZEncoder forward.

    r_ref    : (tile, ninp)   activations (matmul dtype)
    w1_ref   : (ninp, F)      layer-0 weight, columns zero-padded to F
    w_ref    : (3, F, F)      packed weights: [shared2, shared3, [wm1 || ws1]]
    wout_ref : (F, OUT_F)     blockdiag(wm2, ws2)
    b_ref    : (5, F) f32     packed biases (layer0 first, same order)
    out_ref  : (tile, OUT_F)  cols [0:nout)=mu, [nout:2*nout)=sigma
    """
    mm_dtype = w1_ref.dtype
    biases = b_ref[...]                          # (5, F) f32, tiny, resident

    def linear(h, w, layer):
        acc = jnp.dot(h.astype(mm_dtype), w,
                      preferred_element_type=jnp.float32)
        return acc + biases[layer][: w.shape[-1]]   # f32 epilogue

    x = r_ref[...]
    # shared MLP: Linear -> ReLU -> Linear -> ReLU -> Linear
    h = jnp.maximum(linear(x, w1_ref[...], 0), 0.0)
    h = jnp.maximum(linear(h, w_ref[0], 1), 0.0)
    shared = linear(h, w_ref[1], 2)
    # fused zmean/zstd branches: a single Linear -> ReLU -> Linear chain
    hb = jnp.maximum(linear(shared, w_ref[2], 3), 0.0)
    z = linear(hb, wout_ref[...], 4)             # (tile, OUT_F) f32
    sig = 0.1 + 0.9 * jax.nn.sigmoid(z)          # EUP slot; full width
    out_f = out_ref.shape[-1]
    col = jax.lax.broadcasted_iota(jnp.int32, (1, out_f), 1)   # one vreg row
    # cols < nout keep the raw value (mu); the rest get the sigma transform
    out_ref[...] = jnp.where(col < nout, z, sig).astype(out_ref.dtype)


def init_params(key, ninp, nout, nhid):
    """Deterministic synthetic parameters.  Weights stored as (in, out)."""
    ks = jax.random.split(key, 7)

    def lin(k, din, dout):
        kw, kb = jax.random.split(k)
        w = jax.random.normal(kw, (din, dout), jnp.float32) / jnp.sqrt(din)
        b = jax.random.normal(kb, (1, dout), jnp.float32) * 0.01
        return w, b

    p = {}
    p["w1"], p["b1"] = lin(ks[0], ninp, nhid)       # shared: ninp -> nhid
    p["w2"], p["b2"] = lin(ks[1], nhid, nhid)       # shared: nhid -> nhid
    p["w3"], p["b3"] = lin(ks[2], nhid, nhid)       # shared: nhid -> nhid
    p["wm1"], p["bm1"] = lin(ks[3], nhid, nhid)     # zmean hidden
    p["wm2"], p["bm2"] = lin(ks[4], nhid, nout)     # zmean out
    p["ws1"], p["bs1"] = lin(ks[5], nhid, nhid)     # zstd hidden
    p["ws2"], p["bs2"] = lin(ks[6], nhid, nout)     # zstd out
    return p


def pack_params(p, matmul_dtype=jnp.bfloat16):
    """Pack the 14 PyTorch-style tensors into 4 lane-padded slabs."""
    ninp, nhid = p["w1"].shape
    nout = p["wm2"].shape[1]
    F = _round_up(max(2 * nhid, 2 * nout), 128)
    OUT_F = _round_up(2 * nout, 128)

    # layer-0 weight: (ninp, F)
    w1 = jnp.zeros((ninp, F), jnp.float32).at[:, :nhid].set(p["w1"])

    # packed weight slab (3, F, F): shared2, shared3, [wm1 || ws1]
    wslab = jnp.zeros((3, F, F), jnp.float32)
    wslab = wslab.at[0, :nhid, :nhid].set(p["w2"])
    wslab = wslab.at[1, :nhid, :nhid].set(p["w3"])
    wslab = wslab.at[2, :nhid, :nhid].set(p["wm1"])
    wslab = wslab.at[2, :nhid, nhid:2 * nhid].set(p["ws1"])

    # final fused branch-2 weight: blockdiag(wm2, ws2), width OUT_F only
    wout = jnp.zeros((F, OUT_F), jnp.float32)
    wout = wout.at[:nhid, :nout].set(p["wm2"])
    wout = wout.at[nhid:2 * nhid, nout:2 * nout].set(p["ws2"])

    # packed bias slab (5, F); kept f32 so the epilogue stays exact
    bslab = jnp.zeros((5, F), jnp.float32)
    bslab = bslab.at[0, :nhid].set(p["b1"].ravel())
    bslab = bslab.at[1, :nhid].set(p["b2"].ravel())
    bslab = bslab.at[2, :nhid].set(p["b3"].ravel())
    bslab = bslab.at[3, :nhid].set(p["bm1"].ravel())
    bslab = bslab.at[3, nhid:2 * nhid].set(p["bs1"].ravel())
    bslab = bslab.at[4, :nout].set(p["bm2"].ravel())
    bslab = bslab.at[4, nout:2 * nout].set(p["bs2"].ravel())

    return (w1.astype(matmul_dtype), wslab.astype(matmul_dtype),
            wout.astype(matmul_dtype), bslab)


@functools.partial(jax.jit,
                   static_argnames=("nout", "batch_tile", "out_dtype"))
def zencoder_forward_packed(r, w1, wslab, wout, bslab, *, nout,
                            batch_tile=4096, out_dtype=jnp.float32):
    """Returns the packed (B_pad, OUT_F) output slab.

    Columns [0:nout) hold mu, [nout:2*nout) hold sigma; rows >= B are padding.
    Slice at the consumer (inside a larger jit) with unpack_mu_sigma() so no
    extra XLA copy passes over the output stream.
    """
    B, ninp = r.shape
    F = wslab.shape[-1]
    OUT_F = wout.shape[-1]
    mm_dtype = w1.dtype
    mm_sz = jnp.dtype(mm_dtype).itemsize
    out_sz = jnp.dtype(out_dtype).itemsize
    sub = max(_sublane(mm_dtype), _sublane(out_dtype))

    # Large batch slabs so the ~0.35us/step overhead amortizes; keep >= 2 grid
    # steps once the batch is big enough (v7x megacore gets both TCs busy).
    tile = min(batch_tile, max(B, sub))
    if B >= 2048:
        tile = min(tile, pl.cdiv(B, 2))
    tile = _round_up(tile, sub)
    B_pad = _round_up(B, tile)
    if B_pad != B:
        r = jnp.pad(r, ((0, B_pad - B), (0, 0)))
    r = r.astype(mm_dtype)                    # activation stream in matmul dtype
    grid = (B_pad // tile,)

    weight_bytes = ((w1.size + wslab.size + wout.size) * mm_sz
                    + bslab.size * 4)
    flops = 2 * B_pad * (ninp * F + 3 * F * F + F * OUT_F)
    bytes_accessed = (B_pad * ninp * mm_sz + weight_bytes
                      + B_pad * OUT_F * out_sz)

    # Explicit scoped-VMEM budget so large batch-tile sweeps don't trip the
    # 16/32 MiB defaults; capped below v7x's 64 MiB physical VMEM.
    vmem_need = (2 * tile * ninp * mm_sz + 2 * tile * OUT_F * out_sz
                 + 2 * weight_bytes + 6 * tile * F * 4)
    vmem_limit = int(min(max(vmem_need + (8 << 20), 32 << 20), 56 << 20))

    out = pl.pallas_call(
        functools.partial(zencoder_kernel, nout=nout),
        grid=grid,
        in_specs=[
            pl.BlockSpec((tile, ninp), lambda i: (i, 0)),     # batch-tiled r
            pl.BlockSpec((ninp, F), lambda i: (0, 0)),        # resident params
            pl.BlockSpec((3, F, F), lambda i: (0, 0, 0)),
            pl.BlockSpec((F, OUT_F), lambda i: (0, 0)),
            pl.BlockSpec((5, F), lambda i: (0, 0)),
        ],
        out_specs=pl.BlockSpec((tile, OUT_F), lambda i: (i, 0)),
        out_shape=jax.ShapeDtypeStruct((B_pad, OUT_F), out_dtype),
        compiler_params=pltpu.CompilerParams(
            dimension_semantics=("parallel",),                # megacore on v7x
            vmem_limit_bytes=vmem_limit,
        ),
        cost_estimate=pl.CostEstimate(
            flops=int(flops),
            transcendentals=int(B_pad * OUT_F),
            bytes_accessed=int(bytes_accessed),
        ),
    )(r, w1, wslab, wout, bslab)
    return out


def unpack_mu_sigma(packed, batch, nout):
    """Consumer-side unpack; call inside the consumer's jit so XLA fuses."""
    mu = packed[:batch, :nout]
    sigma = packed[:batch, nout:2 * nout]
    return mu, sigma


def zencoder_reference(r, p):
    """Pure-JAX reference of the same forward pass (unpacked params)."""
    lin = lambda x, w, b: x @ w + b
    h = jax.nn.relu(lin(r, p["w1"], p["b1"]))
    h = jax.nn.relu(lin(h, p["w2"], p["b2"]))
    shared = lin(h, p["w3"], p["b3"])
    hm = jax.nn.relu(lin(shared, p["wm1"], p["bm1"]))
    mu = lin(hm, p["wm2"], p["bm2"])
    hs = jax.nn.relu(lin(shared, p["ws1"], p["bs1"]))
    sigma = 0.1 + 0.9 * jax.nn.sigmoid(lin(hs, p["ws2"], p["bs2"]))
    return mu, sigma


if __name__ == "__main__":
    batch, ninp, nhid, nout = 8, 32, 16, 8

    key = jax.random.PRNGKey(0)
    k_r, k_p = jax.random.split(key)
    r = jax.random.normal(k_r, (batch, ninp), jnp.float32)
    params = init_params(k_p, ninp, nout, nhid)
    mu_ref, sigma_ref = zencoder_reference(r, params)

    # 1) default bf16 matmul path (f32 accumulate + f32 epilogue)
    w1, wslab, wout, bslab = pack_params(params)          # bf16 by default
    out = zencoder_forward_packed(r, w1, wslab, wout, bslab, nout=nout)
    jax.block_until_ready(out)
    mu, sigma = unpack_mu_sigma(out, batch, nout)
    assert jnp.allclose(mu, mu_ref, atol=5e-2, rtol=5e-2)
    assert jnp.allclose(sigma, sigma_ref, atol=5e-2, rtol=5e-2)

    # 2) f32 matmul path (exact vs. reference)
    w1f, wslabf, woutf, bslabf = pack_params(params, matmul_dtype=jnp.float32)
    outf = zencoder_forward_packed(r, w1f, wslabf, woutf, bslabf, nout=nout)
    jax.block_until_ready(outf)
    mu_f, sigma_f = unpack_mu_sigma(outf, batch, nout)
    assert jnp.allclose(mu_f, mu_ref, atol=1e-5, rtol=1e-5)
    assert jnp.allclose(sigma_f, sigma_ref, atol=1e-5, rtol=1e-5)

    # 3) multi-tile grid + uneven batch padding (f32, 2 grid steps)
    r2 = jax.random.normal(k_r, (13, ninp), jnp.float32)
    out2 = zencoder_forward_packed(r2, w1f, wslabf, woutf, bslabf,
                                   nout=nout, batch_tile=8)
    jax.block_until_ready(out2)
    mu2, sigma2 = unpack_mu_sigma(out2, 13, nout)
    mu2_ref, sigma2_ref = zencoder_reference(r2, params)
    assert jnp.allclose(mu2, mu2_ref, atol=1e-5, rtol=1e-5)
    assert jnp.allclose(sigma2, sigma2_ref, atol=1e-5, rtol=1e-5)

    # 4) bf16 path with multiple grid steps + bf16-safe tile rounding (16)
    r3 = jax.random.normal(k_r, (40, ninp), jnp.float32)
    out3 = zencoder_forward_packed(r3, w1, wslab, wout, bslab,
                                   nout=nout, batch_tile=16)
    jax.block_until_ready(out3)
    mu3, sigma3 = unpack_mu_sigma(out3, 40, nout)
    mu3_ref, sigma3_ref = zencoder_reference(r3, params)
    assert jnp.allclose(mu3, mu3_ref, atol=5e-2, rtol=5e-2)
    assert jnp.allclose(sigma3, sigma3_ref, atol=5e-2, rtol=5e-2)

    # 5) bf16 output slab option (halves HBM writeback on v5e/v6e)
    out4 = zencoder_forward_packed(r, w1, wslab, wout, bslab, nout=nout,
                                   out_dtype=jnp.bfloat16)
    jax.block_until_ready(out4)
    mu4, sigma4 = unpack_mu_sigma(out4, batch, nout)
    assert jnp.allclose(mu4.astype(jnp.float32), mu_ref, atol=1e-1, rtol=1e-1)
    assert jnp.allclose(sigma4.astype(jnp.float32), sigma_ref,
                        atol=1e-1, rtol=1e-1)

    print("KERNEL_OK")
</pallas_src>

<mosaic_0001>
module attributes {stable_mosaic.version = 11 : i64} {
  func.func @zencoder_kernel(%arg0: i32, %arg1: memref<16x32xbf16, #tpu.memory_space<vmem>>, %arg2: memref<32x128xbf16, #tpu.memory_space<vmem>>, %arg3: memref<3x128x128xbf16, #tpu.memory_space<vmem>>, %arg4: memref<128x128xbf16, #tpu.memory_space<vmem>>, %arg5: memref<5x128xf32, #tpu.memory_space<vmem>>, %arg6: memref<16x128xf32, #tpu.memory_space<vmem>>) attributes {dimension_semantics = [#tpu.dimension_semantics<parallel>], iteration_bounds = array<i64: 1>, scalar_prefetch = 0 : i64, scratch_operands = 0 : i64, tpu.core_type = #tpu.core_type<tc>, window_params = [{transform_indices = @transform_0, window_bounds = array<i64: 16, 32>}, {pipeline_mode = #tpu.pipeline_mode<synchronous>, transform_indices = @transform_1, window_bounds = array<i64: 32, 128>}, {pipeline_mode = #tpu.pipeline_mode<synchronous>, transform_indices = @transform_2, window_bounds = array<i64: 3, 128, 128>}, {pipeline_mode = #tpu.pipeline_mode<synchronous>, transform_indices = @transform_3, window_bounds = array<i64: 128, 128>}, {pipeline_mode = #tpu.pipeline_mode<synchronous>, transform_indices = @transform_4, window_bounds = array<i64: 5, 128>}, {transform_indices = @transform_5, window_bounds = array<i64: 16, 128>}]} {
    %c0 = arith.constant 0 : index
    %c0_0 = arith.constant 0 : index
    %0 = vector.load %arg5[%c0, %c0_0] : memref<5x128xf32, #tpu.memory_space<vmem>>, vector<5x128xf32>
    %c0_1 = arith.constant 0 : index
    %c0_2 = arith.constant 0 : index
    %1 = vector.load %arg1[%c0_1, %c0_2] : memref<16x32xbf16, #tpu.memory_space<vmem>>, vector<16x32xbf16>
    %c0_3 = arith.constant 0 : index
    %c0_4 = arith.constant 0 : index
    %2 = vector.load %arg2[%c0_3, %c0_4] : memref<32x128xbf16, #tpu.memory_space<vmem>>, vector<32x128xbf16>
    %cst = arith.constant dense<0.000000e+00> : vector<16x128xf32>
    %3 = tpu.matmul %1, %2, %cst {dimension_numbers = #tpu.dot_dimension_numbers<[1], [0], [0], [1], [0, 0, 1, 1], [], []>} : vector<16x32xbf16>, vector<32x128xbf16>, vector<16x128xf32> -> vector<16x128xf32>
    %4 = vector.extract_strided_slice %0 {offsets = [0, 0], sizes = [1, 128], strides = [1, 1]} : vector<5x128xf32> to vector<1x128xf32>
    %5 = vector.shape_cast %4 : vector<1x128xf32> to vector<128xf32>
    %6 = vector.shape_cast %5 : vector<128xf32> to vector<1x128xf32>
    %7 = vector.broadcast %6 : vector<1x128xf32> to vector<16x128xf32>
    %8 = arith.addf %3, %7 : vector<16x128xf32>
    %cst_5 = arith.constant 0.000000e+00 : f32
    %9 = vector.broadcast %cst_5 : f32 to vector<16x128xf32>
    %10 = arith.maximumf %8, %9 : vector<16x128xf32>
    %c0_6 = arith.constant 0 : index
    %c0_7 = arith.constant 0 : index
    %c0_8 = arith.constant 0 : index
    %11 = vector.load %arg3[%c0_6, %c0_7, %c0_8] : memref<3x128x128xbf16, #tpu.memory_space<vmem>>, vector<1x128x128xbf16>
    %12 = vector.shape_cast %11 : vector<1x128x128xbf16> to vector<128x128xbf16>
    %13 = arith.truncf %10 : vector<16x128xf32> to vector<16x128xbf16>
    %cst_9 = arith.constant dense<0.000000e+00> : vector<16x128xf32>
    %14 = tpu.matmul %13, %12, %cst_9 {dimension_numbers = #tpu.dot_dimension_numbers<[1], [0], [0], [1], [0, 0, 1, 1], [], []>} : vector<16x128xbf16>, vector<128x128xbf16>, vector<16x128xf32> -> vector<16x128xf32>
    %15 = vector.extract_strided_slice %0 {offsets = [1, 0], sizes = [1, 128], strides = [1, 1]} : vector<5x128xf32> to vector<1x128xf32>
    %16 = vector.shape_cast %15 : vector<1x128xf32> to vector<128xf32>
    %17 = vector.shape_cast %16 : vector<128xf32> to vector<1x128xf32>
    %18 = vector.broadcast %17 : vector<1x128xf32> to vector<16x128xf32>
    %19 = arith.addf %14, %18 : vector<16x128xf32>
    %cst_10 = arith.constant 0.000000e+00 : f32
    %20 = vector.broadcast %cst_10 : f32 to vector<16x128xf32>
    %21 = arith.maximumf %19, %20 : vector<16x128xf32>
    %c1 = arith.constant 1 : index
    %c0_11 = arith.constant 0 : index
    %c0_12 = arith.constant 0 : index
    %22 = vector.load %arg3[%c1, %c0_11, %c0_12] : memref<3x128x128xbf16, #tpu.memory_space<vmem>>, vector<1x128x128xbf16>
    %23 = vector.shape_cast %22 : vector<1x128x128xbf16> to vector<128x128xbf16>
    %24 = arith.truncf %21 : vector<16x128xf32> to vector<16x128xbf16>
    %cst_13 = arith.constant dense<0.000000e+00> : vector<16x128xf32>
    %25 = tpu.matmul %24, %23, %cst_13 {dimension_numbers = #tpu.dot_dimension_numbers<[1], [0], [0], [1], [0, 0, 1, 1], [], []>} : vector<16x128xbf16>, vector<128x128xbf16>, vector<16x128xf32> -> vector<16x128xf32>
    %26 = vector.extract_strided_slice %0 {offsets = [2, 0], sizes = [1, 128], strides = [1, 1]} : vector<5x128xf32> to vector<1x128xf32>
    %27 = vector.shape_cast %26 : vector<1x128xf32> to vector<128xf32>
    %28 = vector.shape_cast %27 : vector<128xf32> to vector<1x128xf32>
    %29 = vector.broadcast %28 : vector<1x128xf32> to vector<16x128xf32>
    %30 = arith.addf %25, %29 : vector<16x128xf32>
    %c2 = arith.constant 2 : index
    %c0_14 = arith.constant 0 : index
    %c0_15 = arith.constant 0 : index
    %31 = vector.load %arg3[%c2, %c0_14, %c0_15] : memref<3x128x128xbf16, #tpu.memory_space<vmem>>, vector<1x128x128xbf16>
    %32 = vector.shape_cast %31 : vector<1x128x128xbf16> to vector<128x128xbf16>
    %33 = arith.truncf %30 : vector<16x128xf32> to vector<16x128xbf16>
    %cst_16 = arith.constant dense<0.000000e+00> : vector<16x128xf32>
    %34 = tpu.matmul %33, %32, %cst_16 {dimension_numbers = #tpu.dot_dimension_numbers<[1], [0], [0], [1], [0, 0, 1, 1], [], []>} : vector<16x128xbf16>, vector<128x128xbf16>, vector<16x128xf32> -> vector<16x128xf32>
    %35 = vector.extract_strided_slice %0 {offsets = [3, 0], sizes = [1, 128], strides = [1, 1]} : vector<5x128xf32> to vector<1x128xf32>
    %36 = vector.shape_cast %35 : vector<1x128xf32> to vector<128xf32>
    %37 = vector.shape_cast %36 : vector<128xf32> to vector<1x128xf32>
    %38 = vector.broadcast %37 : vector<1x128xf32> to vector<16x128xf32>
    %39 = arith.addf %34, %38 : vector<16x128xf32>
    %cst_17 = arith.constant 0.000000e+00 : f32
    %40 = vector.broadcast %cst_17 : f32 to vector<16x128xf32>
    %41 = arith.maximumf %39, %40 : vector<16x128xf32>
    %c0_18 = arith.constant 0 : index
    %c0_19 = arith.constant 0 : index
    %42 = vector.load %arg4[%c0_18, %c0_19] : memref<128x128xbf16, #tpu.memory_space<vmem>>, vector<128x128xbf16>
    %43 = arith.truncf %41 : vector<16x128xf32> to vector<16x128xbf16>
    %cst_20 = arith.constant dense<0.000000e+00> : vector<16x128xf32>
    %44 = tpu.matmul %43, %42, %cst_20 {dimension_numbers = #tpu.dot_dimension_numbers<[1], [0], [0], [1], [0, 0, 1, 1], [], []>} : vector<16x128xbf16>, vector<128x128xbf16>, vector<16x128xf32> -> vector<16x128xf32>
    %45 = vector.extract_strided_slice %0 {offsets = [4, 0], sizes = [1, 128], strides = [1, 1]} : vector<5x128xf32> to vector<1x128xf32>
    %46 = vector.shape_cast %45 : vector<1x128xf32> to vector<128xf32>
    %47 = vector.shape_cast %46 : vector<128xf32> to vector<1x128xf32>
    %48 = vector.broadcast %47 : vector<1x128xf32> to vector<16x128xf32>
    %49 = arith.addf %44, %48 : vector<16x128xf32>
    %50 = arith.negf %49 : vector<16x128xf32>
    %51 = math.exp %50 : vector<16x128xf32>
    %cst_21 = arith.constant 1.000000e+00 : f32
    %52 = vector.broadcast %cst_21 : f32 to vector<16x128xf32>
    %53 = arith.addf %52, %51 : vector<16x128xf32>
    %54 = arith.divf %52, %53 : vector<16x128xf32>
    %cst_22 = arith.constant 0.899999976 : f32
    %55 = vector.broadcast %cst_22 : f32 to vector<16x128xf32>
    %56 = arith.mulf %55, %54 : vector<16x128xf32>
    %cst_23 = arith.constant 1.000000e-01 : f32
    %57 = vector.broadcast %cst_23 : f32 to vector<16x128xf32>
    %58 = arith.addf %57, %56 : vector<16x128xf32>
    %59 = tpu.iota {dimensions = array<i32: 1>} : vector<1x128xi32>
    %c8_i32 = arith.constant 8 : i32
    %60 = vector.broadcast %c8_i32 : i32 to vector<1x128xi32>
    %61 = arith.cmpi slt, %59, %60 : vector<1x128xi32>
    %62 = vector.shape_cast %61 : vector<1x128xi1> to vector<1x128xi1>
    %63 = vector.broadcast %62 : vector<1x128xi1> to vector<16x128xi1>
    %64 = arith.select %63, %49, %58 : vector<16x128xi1>, vector<16x128xf32>
    %c0_24 = arith.constant 0 : index
    %c0_25 = arith.constant 0 : index
    %65 = vector.load %arg6[%c0_24, %c0_25] : memref<16x128xf32, #tpu.memory_space<vmem>>, vector<16x128xf32>
    tpu.vector_store %arg6[%c0_24, %c0_25], %64 {strides = array<i32>} : memref<16x128xf32, #tpu.memory_space<vmem>>, vector<16x128xf32>,
    return
  }
  func.func @transform_0(%arg0: i32) -> (i32, i32) {
    %c0_i32 = arith.constant 0 : i32
    %c0_i32_0 = arith.constant 0 : i32
    return %arg0, %c0_i32 : i32, i32
  }
  func.func @transform_1(%arg0: i32) -> (i32, i32) {
    %c0_i32 = arith.constant 0 : i32
    %c0_i32_0 = arith.constant 0 : i32
    %c0_i32_1 = arith.constant 0 : i32
    return %c0_i32, %c0_i32_0 : i32, i32
  }
  func.func @transform_2(%arg0: i32) -> (i32, i32, i32) {
    %c0_i32 = arith.constant 0 : i32
    %c0_i32_0 = arith.constant 0 : i32
    %c0_i32_1 = arith.constant 0 : i32
    %c0_i32_2 = arith.constant 0 : i32
    return %c0_i32, %c0_i32_0, %c0_i32_1 : i32, i32, i32
  }
  func.func @transform_3(%arg0: i32) -> (i32, i32) {
    %c0_i32 = arith.constant 0 : i32
    %c0_i32_0 = arith.constant 0 : i32
    %c0_i32_1 = arith.constant 0 : i32
    return %c0_i32, %c0_i32_0 : i32, i32
  }
  func.func @transform_4(%arg0: i32) -> (i32, i32) {
    %c0_i32 = arith.constant 0 : i32
    %c0_i32_0 = arith.constant 0 : i32
    %c0_i32_1 = arith.constant 0 : i32
    return %c0_i32, %c0_i32_0 : i32, i32
  }
  func.func @transform_5(%arg0: i32) -> (i32, i32) {
    %c0_i32 = arith.constant 0 : i32
    %c0_i32_0 = arith.constant 0 : i32
    return %arg0, %c0_i32 : i32, i32
  }
}

</mosaic_0001>

<bundles_post_ra>
// kernel: zencoder_forward_packed.1
= control target key start
LH: loop header
LB: loop body
LE: loop exit
PB: predicated region body
PF: predicated region fallthrough
CT: control target
= control target key end

     0   :  { %10 = vsyncpa [#allocation3], 0  ;;  %s1017_s0 = inlined_call_operand.vmem [shape: bf16[16,32], index: 0, kind: input, shape index: {}]   ;;  %s1018_s1 = inlined_call_operand.vmem [shape: bf16[32,128], index: 1, kind: input, shape index: {}]   ;;  %s1019_s2 = inlined_call_operand.hbm [shape: bf16[3,128,128], index: 2, kind: input, shape index: {}]   ;;  %s1020_s3 = inlined_call_operand.hbm [shape: bf16[128,128], index: 3, kind: input, shape index: {}]   ;;  %s1021_s4 = inlined_call_operand.vmem [shape: f32[5,128], index: 4, kind: input, shape index: {}]   ;;  %s1022_s5 = inlined_call_operand.hbm [shape: f32[16,128], index: 5, kind: output, shape index: {}]  }
   0x1   :  { %11 = vsyncpa [#allocation6], 0 }
   0x2   :  { %12 = vsyncpa [#allocation4], 0  ;;  %s897_s18 = smov [#allocation2]  }
   0x3   :  { %s22_s19 = sshll.u32 %s897_s18, 4  ;;  %s23_s19 = int_to_ptr.vmem [resolvable:$true] %s22_s19 }
   0x4   :  { %s839_s20 = scalar_lea.vmem %s23_s19, 3072  ;;  %p844_p1 = scmp.lt.s32.totalorder %s23_s19, %s23_s19 }
   0x5   :  { %p840_p0 = scmp.ne.s32.totalorder %s23_s19, %s839_s20  ;;  %p845_p2 = scmp.lt.s32.totalorder %s839_s20, %s839_s20 }
   0x7   :  { %p846_p3 = por %p845_p2, %p844_p1 }
   0x9   :  { %p847_p4 = pnand %p846_p3, %p840_p0 }
   0xb   :  { %850 = shalt.err (!%p847_p4)
}
   0xc   :  { %s898_s21 = smov 64   ;;  %s899_s22 = smov 4  }
   0xd   :  { %28 = dma.hbm_to_vmem [thread:$0]  %s1019_s2, 3072, %s23_s19, [#allocation3], %s898_s21, %s898_s21, %s899_s22  }
   0xe   :  { %s900_s25 = smov [#allocation5]  }
   0xf   :  { %s34_s26 = sshll.u32 %s900_s25, 4  ;;  %s35_s26 = int_to_ptr.vmem [resolvable:$true] %s34_s26 }
  0x10   :  { %s859_s27 = scalar_lea.vmem %s35_s26, 1024  ;;  %p864_p6 = scmp.lt.s32.totalorder %s35_s26, %s35_s26 }
  0x11   :  { %p860_p5 = scmp.ne.s32.totalorder %s35_s26, %s859_s27  ;;  %p865_p7 = scmp.lt.s32.totalorder %s859_s27, %s859_s27 }
  0x13   :  { %p866_p8 = por %p865_p7, %p864_p6 }
  0x15   :  { %p867_p9 = pnand %p866_p8, %p860_p5 }
  0x17   :  { %870 = shalt.err (!%p867_p9)
}
  0x18   :  { %40 = dma.hbm_to_vmem [thread:$0]  %s1020_s3, 1024, %s35_s26, [#allocation6], %s898_s21, %s898_s21, %s899_s22  }
  0x19   :  { %891 = dma.done.wait [#allocation3], 3072  }
  0x1a   :  { %892 = vsyncadd [#allocation3], 4294964224 }
  0x1b   :  { %893 = dma.done.wait [#allocation6], 1024  }
  0x1c   :  { %894 = vsyncadd [#allocation6], 4294966272  ;;  %v901_v0 = vmov 0.0   ;;  %vm902_vm0 = vmmov 0   ;;  %v788_v1 = vld [vmem:[%s1018_s1 + $0x8] sm:$0xff]   ;;  %v789_v2 = vld [vmem:[%s1018_s1] sm:$0xff]   ;;  %v57_v17 = vlaneseq }
  0x1d   :  { %691 = vmatprep.subr.bf16.mxu0 %v901_v0  ;;  %695 = vmatprep.mubr.msk.bf16.mxu0 %vm902_vm0, %v901_v0  ;;  %v791_v3 = vld [vmem:[#allocation2 + $0x38] sm:$0xff]   ;;  %v790_v4 = vld [vmem:[%s1017_s0] sm:$0xff]   ;;  %v792_v5 = vld [vmem:[#allocation2 + $0x30] sm:$0xff]   ;;  %vm78_vm1 = vcmask 261120  }
  0x1e   :  { %699 = vmatprep.subr.bf16.mxu1 %v901_v0  ;;  %715 = vmatprep.mubr.msk.bf16.mxu1 %vm902_vm0, %v901_v0  ;;  %v793_v6 = vld [vmem:[#allocation2 + $0x28] sm:$0xff]   ;;  %v794_v7 = vld [vmem:[#allocation2 + $0x20] sm:$0xff]   ;;  %v795_v8 = vld [vmem:[#allocation2 + $0x18] sm:$0xff]   ;;  %v975_v18 = vshrl.u32 %v57_v17, 7 }
  0x1f   :  { %692 = vmatpush3.bf16.msra.mxu0 %v788_v1  ;;  %700 = vmatpush3.bf16.msra.mxu1 %v791_v3  ;;  %v796_v9 = vld [vmem:[#allocation2 + $0x10] sm:$0xff]   ;;  %v797_v10 = vld [vmem:[#allocation2 + $0x8] sm:$0xff]   ;;  %v798_v11 = vld [vmem:[#allocation2] sm:$0xff]  }
  0x20   :  { %693 = vmatprep.subr.bf16.mxu0 %v901_v0  ;;  %701 = vmatprep.subr.bf16.mxu1 %v901_v0  ;;  %v799_v12 = vld [vmem:[#allocation2 + $0x78] sm:$0xff]   ;;  %v800_v13 = vld [vmem:[#allocation2 + $0x70] sm:$0xff]   ;;  %v801_v14 = vld [vmem:[#allocation2 + $0x68] sm:$0xff]   ;;  %v59_v19 = vsub.s32 0, %v975_v18  ;;  %v144_v40 = vsub.s32 1, %v975_v18  ;;  %v257_v58 = vsub.s32 2, %v975_v18 }
  0x21   :  { %v802_v15 = vld [vmem:[#allocation2 + $0x60] sm:$0xff]   ;;  %v803_v16 = vld [vmem:[#allocation2 + $0x58] sm:$0xff]   ;;  %v804_v31 = vld [vmem:[#allocation2 + $0x50] sm:$0xff]  }
  0x22   :  { %v981_v20 = vld [vmem:[%s1021_s4] sm:$0x1f]  ;;  %v805_v32 = vld [vmem:[#allocation2 + $0x48] sm:$0xff]   ;;  %v807_v34 = vld [vmem:[#allocation2 + $0xb8] sm:$0xff]   ;;  %s903_s4 = smov [#allocation7]  }
  0x23   :  { %694 = vmatpush3.bf16.msra.mxu0 %v789_v2  ;;  %702 = vmatpush3.bf16.msra.mxu1 %v792_v5  ;;  %v60_v21 = vrot.slane %v981_v20, %v59_v19  ;;  %v806_v33 = vld [vmem:[#allocation2 + $0x40] sm:$0xff]   ;;  %v808_v35 = vld [vmem:[#allocation2 + $0xb0] sm:$0xff]   ;;  %v809_v36 = vld [vmem:[#allocation2 + $0xa8] sm:$0xff]   ;;  %v145_v41 = vrot.slane %v981_v20, %v144_v40  ;;  %v258_v60 = vrot.slane %v981_v20, %v257_v58  ;;  %s601_s9 = sshll.u32 %s903_s4, 4  ;;  %s602_s9 = int_to_ptr.vmem [resolvable:$true] %s601_s9 }
  0x24   :  { %719 = vmatprep.subr.bf16.mxu0 %v901_v0  ;;  %703 = vmatprep.subr.bf16.mxu1 %v901_v0  ;;  %v810_v37 = vld [vmem:[#allocation2 + $0xa0] sm:$0xff]   ;;  %v811_v38 = vld [vmem:[#allocation2 + $0x98] sm:$0xff]   ;;  %v812_v39 = vld [vmem:[#allocation2 + $0x90] sm:$0xff]   ;;  %s871_s10 = scalar_lea.vmem %s602_s9, 256  ;;  %p876_p11 = scmp.lt.s32.totalorder %s602_s9, %s602_s9 }
  0x25   :  { %v813_v51 = vld [vmem:[#allocation2 + $0x88] sm:$0xff]   ;;  %v814_v52 = vld [vmem:[#allocation2 + $0x80] sm:$0xff]   ;;  %v815_v53 = vld [vmem:[#allocation5 + $0x38] sm:$0xff]   ;;  %p872_p10 = scmp.ne.s32.totalorder %s602_s9, %s871_s10  ;;  %p877_p12 = scmp.lt.s32.totalorder %s871_s10, %s871_s10 }
  0x26   :  { %696 = vmatmul.mubr.msk.bf16.vlgmr.msra.gmra.mxu0 %vm78_vm1, %v790_v4  ;;  %v816_v54 = vld [vmem:[#allocation5 + $0x30] sm:$0xff]   ;;  %v817_v55 = vld [vmem:[#allocation5 + $0x28] sm:$0xff]   ;;  %v818_v56 = vld [vmem:[#allocation5 + $0x20] sm:$0xff]  }
  0x27   :  { %735 = vmatprep.mubr.msk.bf16.mxu0 %vm902_vm0, %v901_v0  ;;  %704 = vmatpush3.bf16.msra.mxu1 %v793_v6  ;;  %v819_v57 = vld [vmem:[#allocation5 + $0x18] sm:$0xff]   ;;  %v820_v4 = vld [vmem:[#allocation5 + $0x10] sm:$0xff]   ;;  %v821_v5 = vld [vmem:[#allocation5 + $0x8] sm:$0xff]   ;;  %p878_p13 = por %p877_p12, %p876_p11 }
  0x28   :  { %705 = vmatprep.subr.bf16.mxu1 %v901_v0  ;;  %720 = vmatpush3.bf16.msra.mxu0 %v799_v12  ;;  %v822_v6 = vld [vmem:[#allocation5] sm:$0xff]  }
  0x29   :  { %721 = vmatprep.subr.bf16.mxu0 %v901_v0  ;;  %p879_p0 = pnand %p878_p13, %p872_p10 }
  0x2b   :  { %706 = vmatpush3.bf16.msra.mxu1 %v794_v7  ;;  %v368_v7 = vsub.s32 3, %v975_v18 }
  0x2c   :  { %707 = vmatprep.subr.bf16.mxu1 %v901_v0  ;;  %722 = vmatpush3.bf16.msra.mxu0 %v800_v13 }
  0x2d   :  { %723 = vmatprep.subr.bf16.mxu0 %v901_v0 }
  0x2f   :  { %708 = vmatpush3.bf16.msra.mxu1 %v795_v8  ;;  %v369_v8 = vrot.slane %v981_v20, %v368_v7 }
  0x30   :  { %709 = vmatprep.subr.bf16.mxu1 %v901_v0  ;;  %724 = vmatpush3.bf16.msra.mxu0 %v801_v14 }
  0x31   :  { %725 = vmatprep.subr.bf16.mxu0 %v901_v0 }
  0x33   :  { %710 = vmatpush3.bf16.msra.mxu1 %v796_v9 }
  0x34   :  { %711 = vmatprep.subr.bf16.mxu1 %v901_v0  ;;  %726 = vmatpush3.bf16.msra.mxu0 %v802_v15 }
  0x35   :  { %727 = vmatprep.subr.bf16.mxu0 %v901_v0 }
  0x37   :  { %712 = vmatpush3.bf16.msra.mxu1 %v797_v10 }
  0x38   :  { %713 = vmatprep.subr.bf16.mxu1 %v901_v0  ;;  %728 = vmatpush3.bf16.msra.mxu0 %v803_v16 }
  0x39   :  { %729 = vmatprep.subr.bf16.mxu0 %v901_v0 }
  0x3b   :  { %714 = vmatpush3.bf16.msra.mxu1 %v798_v11 }
  0x3c   :  { %739 = vmatprep.subr.bf16.mxu1 %v901_v0  ;;  %730 = vmatpush3.bf16.msra.mxu0 %v804_v31 }
  0x3d   :  { %731 = vmatprep.subr.bf16.mxu0 %v901_v0 }
  0x40   :  { %732 = vmatpush3.bf16.msra.mxu0 %v805_v32 }
  0x41   :  { %733 = vmatprep.subr.bf16.mxu0 %v901_v0 }
  0x44   :  { %734 = vmatpush3.bf16.msra.mxu0 %v806_v33 }
  0x45   :  { %759 = vmatprep.subr.bf16.mxu0 %v901_v0 }
  0xe6   :  { %v116_v22 = vpop.f32.mrf.mxu0 }
  0xe7   :  { %v117_v24 = vadd.f32 %v116_v22, %v60_v21 }
  0xe8   :  { %v697_v23 = vpop.f32.mrf.mxu0 }
  0xe9   :  { %v123_v28 = vmax.f32 %v117_v24, 0.0 }
  0xea   :  { %v119_v25 = vpop.f32.mrf.mxu0 }
  0xeb   :  { %v120_v26 = vadd.f32 %v119_v25, %v60_v21  ;;  %v480_v21 = vsub.s32 4, %v975_v18  ;;  %v588_v18 = vand.u32 127, %v57_v17 }
  0xec   :  { %v698_v27 = vpop.f32.mrf.mxu0 }
  0xed   :  { %v124_v29 = vmax.f32 %v120_v26, 0.0  ;;  %vm589_vm2 = vcmp.lt.s32.totalorder %v588_v18, 8 }
  0xef   :  { %v141_v30 = vpack.c.bf16 %v124_v29, %v123_v28 }
  0xf1   :  { %716 = vmatmul.mubr.bf16.vlgmr.msra.gmra.mxu1 %v141_v30 }
  0xf2   :  { %755 = vmatprep.mubr.msk.bf16.mxu1 %vm902_vm0, %v901_v0  ;;  %740 = vmatpush3.bf16.msra.mxu1 %v807_v34 }
  0xf3   :  { %741 = vmatprep.subr.bf16.mxu1 %v901_v0 }
  0xf6   :  { %742 = vmatpush3.bf16.msra.mxu1 %v808_v35 }
  0xf7   :  { %743 = vmatprep.subr.bf16.mxu1 %v901_v0 }
  0xfa   :  { %744 = vmatpush3.bf16.msra.mxu1 %v809_v36 }
  0xfb   :  { %745 = vmatprep.subr.bf16.mxu1 %v901_v0 }
  0xfe   :  { %746 = vmatpush3.bf16.msra.mxu1 %v810_v37 }
  0xff   :  { %747 = vmatprep.subr.bf16.mxu1 %v901_v0 }
 0x102   :  { %748 = vmatpush3.bf16.msra.mxu1 %v811_v38 }
 0x103   :  { %749 = vmatprep.subr.bf16.mxu1 %v901_v0 }
 0x106   :  { %750 = vmatpush3.bf16.msra.mxu1 %v812_v39 }
 0x107   :  { %751 = vmatprep.subr.bf16.mxu1 %v901_v0 }
 0x10a   :  { %752 = vmatpush3.bf16.msra.mxu1 %v813_v51 }
 0x10b   :  { %753 = vmatprep.subr.bf16.mxu1 %v901_v0 }
 0x10e   :  { %754 = vmatpush3.bf16.msra.mxu1 %v814_v52 }
 0x1b1   :  { %v228_v42 = vpop.f32.mrf.mxu1 }
 0x1b2   :  { %v229_v44 = vadd.f32 %v228_v42, %v145_v41 }
 0x1b3   :  { %v717_v43 = vpop.f32.mrf.mxu1 }
 0x1b4   :  { %v235_v48 = vmax.f32 %v229_v44, 0.0 }
 0x1b5   :  { %v231_v45 = vpop.f32.mrf.mxu1 }
 0x1b6   :  { %v232_v46 = vadd.f32 %v231_v45, %v145_v41 }
 0x1b7   :  { %v718_v47 = vpop.f32.mrf.mxu1 }
 0x1b8   :  { %v236_v49 = vmax.f32 %v232_v46, 0.0 }
 0x1ba   :  { %v254_v50 = vpack.c.bf16 %v236_v49, %v235_v48 }
 0x1bc   :  { %736 = vmatmul.mubr.bf16.vlgmr.msra.gmra.mxu0 %v254_v50 }
 0x1bd   :  { %775 = vmatprep.mubr.msk.bf16.mxu0 %vm902_vm0, %v901_v0  ;;  %760 = vmatpush3.bf16.msra.mxu0 %v815_v53 }
 0x1be   :  { %761 = vmatprep.subr.bf16.mxu0 %v901_v0 }
 0x1c1   :  { %762 = vmatpush3.bf16.msra.mxu0 %v816_v54 }
 0x1c2   :  { %763 = vmatprep.subr.bf16.mxu0 %v901_v0 }
 0x1c5   :  { %764 = vmatpush3.bf16.msra.mxu0 %v817_v55 }
 0x1c6   :  { %765 = vmatprep.subr.bf16.mxu0 %v901_v0 }
 0x1c9   :  { %766 = vmatpush3.bf16.msra.mxu0 %v818_v56 }
 0x1ca   :  { %767 = vmatprep.subr.bf16.mxu0 %v901_v0 }
 0x1cd   :  { %768 = vmatpush3.bf16.msra.mxu0 %v819_v57 }
 0x1ce   :  { %769 = vmatprep.subr.bf16.mxu0 %v901_v0 }
 0x1d1   :  { %770 = vmatpush3.bf16.msra.mxu0 %v820_v4 }
 0x1d2   :  { %771 = vmatprep.subr.bf16.mxu0 %v901_v0 }
 0x1d5   :  { %772 = vmatpush3.bf16.msra.mxu0 %v821_v5 }
 0x1d6   :  { %773 = vmatprep.subr.bf16.mxu0 %v901_v0  ;;  %v481_v0 = vrot.slane %v981_v20, %v480_v21 }
 0x1d9   :  { %774 = vmatpush3.bf16.msra.mxu0 %v822_v6 }
 0x27c   :  { %v341_v59 = vpop.f32.mrf.mxu0 }
 0x27d   :  { %v342_v63 = vadd.f32 %v341_v59, %v258_v60 }
 0x27e   :  { %v737_v61 = vpop.f32.mrf.mxu0 }
 0x280   :  { %v344_v62 = vpop.f32.mrf.mxu0 }
 0x281   :  { %v345_v1 = vadd.f32 %v344_v62, %v258_v60 }
 0x282   :  { %v738_v2 = vpop.f32.mrf.mxu0 }
 0x283   :  { %v365_v3 = vpack.c.bf16 %v345_v1, %v342_v63 }
 0x285   :  { %756 = vmatmul.mubr.bf16.vlgmr.msra.gmra.mxu1 %v365_v3 }
 0x345   :  { %v452_v9 = vpop.f32.mrf.mxu1 }
 0x346   :  { %v453_v11 = vadd.f32 %v452_v9, %v369_v8 }
 0x347   :  { %v757_v10 = vpop.f32.mrf.mxu1 }
 0x348   :  { %v459_v15 = vmax.f32 %v453_v11, 0.0 }
 0x349   :  { %v455_v12 = vpop.f32.mrf.mxu1 }
 0x34a   :  { %v456_v13 = vadd.f32 %v455_v12, %v369_v8 }
 0x34b   :  { %v758_v14 = vpop.f32.mrf.mxu1 }
 0x34c   :  { %v460_v16 = vmax.f32 %v456_v13, 0.0 }
 0x34e   :  { %v477_v19 = vpack.c.bf16 %v460_v16, %v459_v15 }
 0x350   :  { %776 = vmatmul.mubr.bf16.vlgmr.msra.gmra.mxu0 %v477_v19 }
 0x410   :  { %v564_v22 = vpop.f32.mrf.mxu0 }
 0x411   :  { %v565_v23 = vadd.f32 %v564_v22, %v481_v0 }
 0x412   :  { %v777_v24 = vpop.f32.mrf.mxu0 }
 0x413   :  { %v650_v25 = vmul.f32 -1.442695, %v565_v23 }
 0x414   :  { %v567_v26 = vpop.f32.mrf.mxu0 }
 0x415   :  { %823 = vpow2.f32 %v650_v25  ;;  %v568_v27 = vadd.f32 %v567_v26, %v481_v0 }
 0x416   :  { %v778_v28 = vpop.f32.mrf.mxu0 }
 0x417   :  { %v651_v29 = vmul.f32 -1.442695, %v568_v27 }
 0x419   :  { %825 = vpow2.f32 %v651_v29 }
 0x422   :  { %v824_v30 = vpop.eup %823 }
 0x423   :  { %v577_v31 = vadd.f32 1.0, %v824_v30 }
 0x425   :  { %827 = vrcp.f32 %v577_v31 }
 0x426   :  { %v826_v32 = vpop.eup %825 }
 0x427   :  { %v578_v33 = vadd.f32 1.0, %v826_v32 }
 0x429   :  { %829 = vrcp.f32 %v578_v33 }
 0x432   :  { %v828_v34 = vpop.eup %827 }
 0x433   :  { %v583_v20 = vmul.f32 0.9, %v828_v34 }
 0x435   :  { %v585_v35 = vadd.f32 0.1, %v583_v20 }
 0x436   :  { %v830_v36 = vpop.eup %829 }
 0x437   :  { %v592_v37 = vsel %vm589_vm2, %v565_v23, %v585_v35  ;;  %v584_v38 = vmul.f32 0.9, %v830_v36 }
 0x438   :  { %594 = vst [vmem:[#allocation7] sm:$0xff] %v592_v37 }
 0x439   :  { %v586_v39 = vadd.f32 0.1, %v584_v38 }
 0x43b   :  { %v593_v40 = vsel %vm589_vm2, %v568_v27, %v586_v39 }
 0x43c   :  { %595 = vst [vmem:[#allocation7 + $0x8] sm:$0xff] %v593_v40 }
 0x43d   :  { %882 = shalt.err (!%p879_p0)
}
 0x43e   :  { %s904_s11 = smov 128   ;;  %s905_s12 = smov 8  }
 0x43f   :  { %607 = dma.vmem_to_hbm [thread:$0]  %s602_s9, 256, %s1022_s5, [#allocation4], %s904_s11, %s904_s11, %s905_s12  }
 0x440   :  { %895 = dma.done.wait [#allocation4], 256  }
 0x441   :  { %896 = vsyncadd [#allocation4], 4294967040 }
 0x442   :  { %611 = vsyncpa [#allocation3], 1 }
 0x443   :  { %612 = vsyncpa [#allocation6], 1 }
 0x444   :  { %613 = vsyncpa [#allocation4], 1 }

</bundles_post_ra>
